<compile_context>
chip_gen: v7x
topology: tpu7x:2x2x1
jax: 0.10.0
libtpu: 0.0.40
codegen_flags: <defaults>
</compile_context>

<pallas_src>
import functools

import jax
import jax.numpy as jnp
from jax.experimental import pallas as pl
from jax.experimental.pallas import tpu as pltpu

_LANE = 128


def _conv_stats_kernel(xcol_ref, w_ref, y_ref, sum_ref, sumsq_ref):
    """One M-tile of the im2col matmul + per-tile BN partial statistics.

    xcol_ref:  (tm, Kp)    im2col rows for this tile (K zero-padded to 128)
    w_ref:     (Kp, Cp)    conv weight as a (K, Cout) matrix (both padded)
    y_ref:     (tm, Cp)    conv output tile (f32, lane-dense)
    sum_ref:   (1, 1, Cp)  per-tile per-channel sum
    sumsq_ref: (1, 1, Cp)  per-tile per-channel sum of squares
    """
    y = jnp.dot(xcol_ref[...], w_ref[...], preferred_element_type=jnp.float32)
    y_ref[...] = y
    sum_ref[...] = jnp.sum(y, axis=0, keepdims=True)[None]
    sumsq_ref[...] = jnp.sum(y * y, axis=0, keepdims=True)[None]


def _bn_relu_kernel(y_ref, sum_ref, sumsq_ref, gamma_ref, beta_ref, o_ref, *,
                    inv_count, eps):
    """Training-mode BatchNorm2d (batch stats, biased var) + ReLU on one M-tile.

    y_ref:            (tm, Cp)   conv output tile
    sum_ref/sumsq_ref:(G, 1, Cp) per-tile partial stats (tiny, read whole)
    gamma_ref/beta_ref:(1, Cp)   BN affine params (zero-padded channels)
    o_ref:            (tm, Cp)   normalized + ReLU output tile
    """
    total = jnp.sum(sum_ref[...], axis=0)        # (1, Cp)
    total_sq = jnp.sum(sumsq_ref[...], axis=0)   # (1, Cp)
    mean = total * inv_count
    # Single-pass E[x^2] - E[x]^2 in f32; clamp tiny negative cancellation.
    var = jnp.maximum(total_sq * inv_count - mean * mean, 0.0)
    scale = jax.lax.rsqrt(var + eps) * gamma_ref[...]
    shift = beta_ref[...] - mean * scale
    y = y_ref[...] * scale + shift
    o_ref[...] = jnp.maximum(y, 0.0).astype(o_ref.dtype)


def aspp_forward(x_nchw, weight_oihw, gamma, beta, *, padding, dilation,
                 eps=1e-5, tile_m=128):
    """NCHW input / OIHW weight (PyTorch convention) -> NCHW output."""
    N, Cin, H, W = x_nchw.shape
    Cout, Cin_w, KH, KW = weight_oihw.shape
    assert Cin_w == Cin  # TODO(synk): grouped conv (groups > 1) not implemented

    # ---- layout prep (wrapper side; negligible at these shapes) -------------
    # stride is fixed to 1 (as in the module); Ho/Wo follow conv arithmetic.
    x = jnp.transpose(x_nchw, (0, 2, 3, 1)).astype(jnp.float32)      # NHWC
    x_pad = jnp.pad(x, ((0, 0), (padding, padding), (padding, padding), (0, 0)))
    Hp, Wp = x_pad.shape[1], x_pad.shape[2]
    Ho = Hp - dilation * (KH - 1)
    Wo = Wp - dilation * (KW - 1)

    # im2col: fold the KH*KW taps into one fat contraction dim K = KH*KW*Cin.
    # TODO(synk): for production-size Cin/HW, replace the HBM im2col with
    # in-kernel DMA of overlapping row windows (memory_space=pl.ANY).
    taps = []
    for kh in range(KH):
        for kw in range(KW):
            h0, w0 = kh * dilation, kw * dilation
            taps.append(x_pad[:, h0:h0 + Ho, w0:w0 + Wo, :])
    K = KH * KW * Cin
    M = N * Ho * Wo
    x_col = jnp.concatenate(taps, axis=-1).reshape(M, K)

    # Pad contraction / channel dims to full lane width, pad M to the row tile.
    Kp = pl.cdiv(K, _LANE) * _LANE
    Cp = pl.cdiv(Cout, _LANE) * _LANE
    tm = tile_m if M >= tile_m else max(8, pl.cdiv(M, 8) * 8)
    Mp = pl.cdiv(M, tm) * tm
    G = Mp // tm

    x_col = jnp.pad(x_col, ((0, Mp - M), (0, Kp - K)))
    w_col = jnp.transpose(weight_oihw, (2, 3, 1, 0)).reshape(K, Cout)
    w_col = jnp.pad(w_col.astype(jnp.float32), ((0, Kp - K), (0, Cp - Cout)))
    gamma_p = jnp.pad(gamma.astype(jnp.float32).reshape(1, Cout),
                      ((0, 0), (0, Cp - Cout)))
    beta_p = jnp.pad(beta.astype(jnp.float32).reshape(1, Cout),
                     ((0, 0), (0, Cp - Cout)))

    cparams = pltpu.CompilerParams(
        dimension_semantics=("parallel",),          # 2-TC sharding on v7x
        vmem_limit_bytes=32 * 1024 * 1024,          # explicit budget, v7x-safe
    )

    # ---- pass 1: conv tiles + per-tile BN partial statistics ----------------
    conv_out, psum, psumsq = pl.pallas_call(
        _conv_stats_kernel,
        out_shape=(
            jax.ShapeDtypeStruct((Mp, Cp), jnp.float32),
            jax.ShapeDtypeStruct((G, 1, Cp), jnp.float32),
            jax.ShapeDtypeStruct((G, 1, Cp), jnp.float32),
        ),
        grid=(G,),
        in_specs=[
            pl.BlockSpec((tm, Kp), lambda i: (i, 0)),
            pl.BlockSpec((Kp, Cp), lambda i: (0, 0)),
        ],
        out_specs=(
            pl.BlockSpec((tm, Cp), lambda i: (i, 0)),
            pl.BlockSpec((1, 1, Cp), lambda i: (i, 0, 0)),
            pl.BlockSpec((1, 1, Cp), lambda i: (i, 0, 0)),
        ),
        compiler_params=cparams,
    )(x_col, w_col)

    # ---- pass 2: reduce stats, normalize + ReLU each tile -------------------
    kernel2 = functools.partial(_bn_relu_kernel, inv_count=1.0 / M, eps=eps)
    out2d = pl.pallas_call(
        kernel2,
        out_shape=jax.ShapeDtypeStruct((Mp, Cp), x_nchw.dtype),
        grid=(G,),
        in_specs=[
            pl.BlockSpec((tm, Cp), lambda i: (i, 0)),
            pl.BlockSpec((G, 1, Cp), lambda i: (0, 0, 0)),
            pl.BlockSpec((G, 1, Cp), lambda i: (0, 0, 0)),
            pl.BlockSpec((1, Cp), lambda i: (0, 0)),
            pl.BlockSpec((1, Cp), lambda i: (0, 0)),
        ],
        out_specs=pl.BlockSpec((tm, Cp), lambda i: (i, 0)),
        compiler_params=cparams,
    )(conv_out, psum, psumsq, gamma_p, beta_p)

    out = out2d[:M, :Cout].reshape(N, Ho, Wo, Cout)
    return jnp.transpose(out, (0, 3, 1, 2))                         # back to NCHW


def _reference(x_nchw, weight_oihw, gamma, beta, *, padding, dilation, eps=1e-5):
    """Pure-JAX reference (lax conv + batch-stats BN + ReLU)."""
    x = jnp.transpose(x_nchw, (0, 2, 3, 1))
    w = jnp.transpose(weight_oihw, (2, 3, 1, 0))
    y = jax.lax.conv_general_dilated(
        x, w, window_strides=(1, 1),
        padding=[(padding, padding), (padding, padding)],
        rhs_dilation=(dilation, dilation),
        dimension_numbers=("NHWC", "HWIO", "NHWC"))
    mean = jnp.mean(y, axis=(0, 1, 2), keepdims=True)
    var = jnp.mean((y - mean) ** 2, axis=(0, 1, 2), keepdims=True)
    y = (y - mean) * jax.lax.rsqrt(var + eps) * gamma + beta
    y = jnp.maximum(y, 0.0)
    return jnp.transpose(y, (0, 3, 1, 2))


if __name__ == "__main__":
    # _ASPPModule(inplanes=4, planes=8, kernel_size=3, padding=2, dilation=2)
    N, Cin, H, W = 2, 4, 16, 16
    Cout, KH, KW = 8, 3, 3
    padding, dilation = 2, 2

    key = jax.random.PRNGKey(0)
    k_x, k_w = jax.random.split(key)

    x = jax.random.normal(k_x, (N, Cin, H, W), jnp.float32)
    # kaiming_normal_ (fan_in, gain=sqrt(2)): std = sqrt(2 / (Cin*KH*KW))
    fan_in = Cin * KH * KW
    weight = jax.random.normal(k_w, (Cout, Cin, KH, KW), jnp.float32) * jnp.sqrt(2.0 / fan_in)
    gamma = jnp.ones((Cout,), jnp.float32)   # bn.weight.fill_(1)
    beta = jnp.zeros((Cout,), jnp.float32)   # bn.bias.zero_()

    out = aspp_forward(x, weight, gamma, beta, padding=padding, dilation=dilation)
    out = jax.block_until_ready(out)

    ref = _reference(x, weight, gamma, beta, padding=padding, dilation=dilation)
    assert out.shape == (N, Cout, H, W), out.shape
    err = float(jnp.max(jnp.abs(out - ref)))
    assert jnp.allclose(out, ref, atol=5e-4, rtol=5e-4), err

    print("KERNEL_OK")
</pallas_src>

<mosaic_0001>
module attributes {stable_mosaic.version = 11 : i64} {
  func.func @_conv_stats_kernel(%arg0: i32, %arg1: memref<128x128xf32, #tpu.memory_space<vmem>>, %arg2: memref<128x128xf32, #tpu.memory_space<vmem>>, %arg3: memref<128x128xf32, #tpu.memory_space<vmem>>, %arg4: memref<1x1x128xf32, #tpu.memory_space<vmem>>, %arg5: memref<1x1x128xf32, #tpu.memory_space<vmem>>) attributes {dimension_semantics = [#tpu.dimension_semantics<parallel>], iteration_bounds = array<i64: 4>, scalar_prefetch = 0 : i64, scratch_operands = 0 : i64, tpu.core_type = #tpu.core_type<tc>, window_params = [{transform_indices = @transform_0, window_bounds = array<i64: 128, 128>}, {pipeline_mode = #tpu.pipeline_mode<synchronous>, transform_indices = @transform_1, window_bounds = array<i64: 128, 128>}, {transform_indices = @transform_2, window_bounds = array<i64: 128, 128>}, {transform_indices = @transform_3, window_bounds = array<i64: 1, 1, 128>}, {transform_indices = @transform_4, window_bounds = array<i64: 1, 1, 128>}]} {
    %c0 = arith.constant 0 : index
    %c0_0 = arith.constant 0 : index
    %0 = vector.load %arg1[%c0, %c0_0] : memref<128x128xf32, #tpu.memory_space<vmem>>, vector<128x128xf32>
    %c0_1 = arith.constant 0 : index
    %c0_2 = arith.constant 0 : index
    %1 = vector.load %arg2[%c0_1, %c0_2] : memref<128x128xf32, #tpu.memory_space<vmem>>, vector<128x128xf32>
    %cst = arith.constant dense<0.000000e+00> : vector<128x128xf32>
    %2 = tpu.matmul %0, %1, %cst {dimension_numbers = #tpu.dot_dimension_numbers<[1], [0], [0], [1], [0, 0, 1, 1], [], []>} : vector<128x128xf32>, vector<128x128xf32>, vector<128x128xf32> -> vector<128x128xf32>
    %c0_3 = arith.constant 0 : index
    %c0_4 = arith.constant 0 : index
    %3 = vector.load %arg3[%c0_3, %c0_4] : memref<128x128xf32, #tpu.memory_space<vmem>>, vector<128x128xf32>
    tpu.vector_store %arg3[%c0_3, %c0_4], %2 {strides = array<i32>} : memref<128x128xf32, #tpu.memory_space<vmem>>, vector<128x128xf32>,
    %cst_5 = arith.constant dense<0.000000e+00> : vector<128xf32>
    %4 = vector.multi_reduction <add>, %2, %cst_5 [0] : vector<128x128xf32> to vector<128xf32>
    %5 = vector.shape_cast %4 : vector<128xf32> to vector<1x128xf32>
    %6 = vector.shape_cast %5 : vector<1x128xf32> to vector<1x1x128xf32>
    %c0_6 = arith.constant 0 : index
    %c0_7 = arith.constant 0 : index
    %c0_8 = arith.constant 0 : index
    %7 = vector.load %arg4[%c0_6, %c0_7, %c0_8] : memref<1x1x128xf32, #tpu.memory_space<vmem>>, vector<1x1x128xf32>
    tpu.vector_store %arg4[%c0_6, %c0_7, %c0_8], %6 {strides = array<i32>} : memref<1x1x128xf32, #tpu.memory_space<vmem>>, vector<1x1x128xf32>,
    %8 = arith.mulf %2, %2 : vector<128x128xf32>
    %cst_9 = arith.constant dense<0.000000e+00> : vector<128xf32>
    %9 = vector.multi_reduction <add>, %8, %cst_9 [0] : vector<128x128xf32> to vector<128xf32>
    %10 = vector.shape_cast %9 : vector<128xf32> to vector<1x128xf32>
    %11 = vector.shape_cast %10 : vector<1x128xf32> to vector<1x1x128xf32>
    %c0_10 = arith.constant 0 : index
    %c0_11 = arith.constant 0 : index
    %c0_12 = arith.constant 0 : index
    %12 = vector.load %arg5[%c0_10, %c0_11, %c0_12] : memref<1x1x128xf32, #tpu.memory_space<vmem>>, vector<1x1x128xf32>
    tpu.vector_store %arg5[%c0_10, %c0_11, %c0_12], %11 {strides = array<i32>} : memref<1x1x128xf32, #tpu.memory_space<vmem>>, vector<1x1x128xf32>,
    return
  }
  func.func @transform_0(%arg0: i32) -> (i32, i32) {
    %c0_i32 = arith.constant 0 : i32
    %c0_i32_0 = arith.constant 0 : i32
    return %arg0, %c0_i32 : i32, i32
  }
  func.func @transform_1(%arg0: i32) -> (i32, i32) {
    %c0_i32 = arith.constant 0 : i32
    %c0_i32_0 = arith.constant 0 : i32
    %c0_i32_1 = arith.constant 0 : i32
    return %c0_i32, %c0_i32_0 : i32, i32
  }
  func.func @transform_2(%arg0: i32) -> (i32, i32) {
    %c0_i32 = arith.constant 0 : i32
    %c0_i32_0 = arith.constant 0 : i32
    return %arg0, %c0_i32 : i32, i32
  }
  func.func @transform_3(%arg0: i32) -> (i32, i32, i32) {
    %c0_i32 = arith.constant 0 : i32
    %c0_i32_0 = arith.constant 0 : i32
    %c0_i32_1 = arith.constant 0 : i32
    return %arg0, %c0_i32, %c0_i32_0 : i32, i32, i32
  }
  func.func @transform_4(%arg0: i32) -> (i32, i32, i32) {
    %c0_i32 = arith.constant 0 : i32
    %c0_i32_0 = arith.constant 0 : i32
    %c0_i32_1 = arith.constant 0 : i32
    return %arg0, %c0_i32, %c0_i32_0 : i32, i32, i32
  }
}

</mosaic_0001>

<bundles_post_ra>
// kernel: tpu_custom_call.1
= control target key start
LH: loop header
LB: loop body
LE: loop exit
PB: predicated region body
PF: predicated region fallthrough
CT: control target
= control target key end

     0   :  { %10 = vsyncpa [#allocation3], 0  ;;  %s1490_s0 = inlined_call_operand.hbm [shape: f32[512,128], index: 0, kind: input, shape index: {}]   ;;  %s1491_s1 = inlined_call_operand.hbm [shape: f32[128,128], index: 1, kind: input, shape index: {}]   ;;  %s1492_s2 = inlined_call_operand.hbm [shape: f32[512,128], index: 2, kind: output, shape index: {0}]   ;;  %s1493_s3 = inlined_call_operand.hbm [shape: f32[4,1,128], index: 3, kind: output, shape index: {1}]   ;;  %s1494_s4 = inlined_call_operand.hbm [shape: f32[4,1,128], index: 4, kind: output, shape index: {2}]  }
   0x1   :  { %12 = vsyncpa [#allocation3 + $0x1], 0 }
   0x2   :  { %13 = vsyncpa [#allocation6], 0 }
   0x3   :  { %14 = vsyncpa [#allocation4], 0 }
   0x4   :  { %16 = vsyncpa [#allocation4 + $0x1], 0 }
   0x5   :  { %17 = vsyncpa [#allocation9], 0 }
   0x6   :  { %19 = vsyncpa [#allocation9 + $0x1], 0  ;;  %s1137_s15 = smov 0   ;;  %s1139_s16 = smov 0  }
   0x7   :  { %s1141_s17 = smov 0   ;;  %s1143_s18 = smov 0  }
   0x8 LB: > { %s1158_s19 = sadd.s32 4294967295, %s1101_s18   ;;  %s686_s20 = sadd.s32 4294967294, %s1101_s18   ;;  %s1101_s18 = sphi %s1143_s18, %s1513_s18   ;;  %s1097_s17 = sphi %s1141_s17, %s1512_s17   ;;  %s1093_s16 = sphi %s1139_s16, %s1511_s16   ;;  %s1089_s15 = sphi %s1137_s15, %s1510_s15  }
   0x9   : > { %p45_p0 = scmp.ne.s32.totalorder %s1093_s16, %s1089_s15  ;;  %p1495_p1 = scmp.eq.s32.totalorder %s1158_s19, 0 }
   0xa   : > { %p96_p3 = scmp.eq.s32.totalorder %s686_s20, 3  ;;  %p687_p5 = scmp.ge.s32.totalorder %s1101_s18, 1 }
   0xb   : > { %p1169_p4 = por %p1495_p1, %p45_p0  ;;  %p155_p7 = scmp.lt.s32.totalorder %s1101_s18, 5 }
   0xc   : > { %p1174_p6 = por %p96_p3, %p45_p0  ;;  %s1103_s24 = smov [#allocation5]  }
   0xd   : > { %s1498_s21 = scalar_select %p1169_p4, 1, 0 }
   0xe   : > { %s1499_s22 = scalar_select %p1174_p6, 1, 0 }
   0xf   : > { %p1179_p8 = pnand %p687_p5, %p155_p7  ;;  %s167_s25 = sshll.u32 %s1103_s24, 4  ;;  %s168_s25 = int_to_ptr.vmem [resolvable:$true] %s167_s25 }
  0x10   : > { %s1192_s27 = sadd.s32 1, %s1101_s18   ;;  %s32_s28 = sadd.s32 1, %s1097_s17 }
  0x11   : > { %s1500_s23 = scalar_select %p1179_p8, 1, 0 }
  0x12   : > { %p854_p9 = pneg %p1179_p8  ;;  %s29_s29 = ssub.s32 %s1101_s18, %s1192_s27 }
  0x13   : > { %s913_s6 = scalar_lea.hbm %s1491_s1, 2048 }
  0x14   : > { %p1187_p10 = pnand %p854_p9, %p1495_p1  ;;  %p914_p11 = scmp.ne.s32.totalorder %s1491_s1, %s913_s6 }
  0x15   : > { %p920_p3 = scmp.lt.u32.totalorder %s913_s6, %s1491_s1 }
  0x16   : > { %p915_p12 = pneg %p1187_p10 }
  0x18   : > { %p916_p13 = pnand %p915_p12, %p914_p11 }
  0x1a   : > { %p917_p0 = pneg %p916_p13 }
  0x1c   : > { %p922_p5 = pnand %p920_p3, %p917_p0 }
  0x1e   : > { %925 = shalt.err (!%p922_p5)
}
  0x1f   : > { %s926_s11 = scalar_lea.vmem %s168_s25, 2048  ;;  %p934_p2 = scmp.lt.s32.totalorder %s168_s25, %s168_s25 }
  0x20   : > { %p927_p7 = scmp.ne.s32.totalorder %s168_s25, %s926_s11  ;;  %p935_p6 = scmp.lt.s32.totalorder %s926_s11, %s926_s11 }
  0x22   : > { %p929_p9 = pnand %p927_p7, %p915_p12  ;;  %p936_p4 = por %p935_p6, %p934_p2 }
  0x24   : > { %p930_p1 = pneg %p929_p9 }
  0x26   : > { %p937_p8 = pnand %p936_p4, %p930_p1 }
  0x28   : > { %940 = shalt.err (!%p937_p8)
}
  0x29   : > { %s1104_s12 = smov 128   ;;  %s1105_s13 = smov 8  }
  0x2a   : > { %857 = dma.hbm_to_vmem [thread:$0]  (!%p1187_p10), %s1491_s1, 2048, %s168_s25, [#allocation6], %s1104_s12, %s1104_s12, %s1105_s13  }
  0x2b   : > { %p30_p1 = scmp.eq.s32.totalorder %s29_s29, 0  ;;  %p39_p2 = scmp.ne.s32.totalorder %s1097_s17, %s1093_s16 }
  0x2c   : > { %p40_p4 = scmp.eq.s32.totalorder %s1101_s18, 0  ;;  %p873_p6 = scmp.lt.s32.totalorder %s1101_s18, 4 }
  0x2d   : > { %s1221_s30 = scalar_select %p30_p1, %s1097_s17, %s32_s28  }
  0x2e   : > { %p41_p8 = por %p40_p4, %p39_p2  ;;  %p1502_p11 = scmp.eq.s32.totalorder %s1158_s19, 3 }
  0x2f   : > { %s181_s26 = sand.u32 1, %s1097_s17   ;;  %s704_s6 = sshll.u32 %s1101_s18, 11 }
  0x30   : > { %p1225_p12 = por %p1502_p11, %p39_p2  ;;  %s690_s7 = sshll.u32 %s181_s26, 7 }
  0x31   : > { %s1234_s10 = scalar_lea.hbm %s1490_s0, %s704_s6  ;;  %s185_s25 = scalar_lea.vmem [#allocation2], %s690_s7 }
  0x32   : > { %s192_s28 = sshll.u32 %s185_s25, 4  ;;  %p1236_p10 = pnand %p873_p6, %p41_p8  ;;  %s1240_s28 = int_to_ptr.vmem [resolvable:$true] %s192_s28 }
  0x33   : > { %s1242_s11 = scalar_lea.sflag [#allocation3], %s181_s26  ;;  %s941_s14 = scalar_lea.hbm %s1234_s10, 2048 }
  0x34   : > { %p942_p13 = scmp.ne.s32.totalorder %s1234_s10, %s941_s14  ;;  %p943_p0 = pneg %p1236_p10 }
  0x35   : > { %s946_s7 = scalar_lea.hbm %s1490_s0, 8192  ;;  %p947_p7 = scmp.lt.u32.totalorder %s1234_s10, %s1490_s0 }
  0x36   : > { %p944_p3 = pnand %p943_p0, %p942_p13  ;;  %p948_p9 = scmp.lt.u32.totalorder %s946_s7, %s941_s14 }
  0x37   : > { %p950_p2 = scmp.lt.u32.totalorder %s941_s14, %s1234_s10 }
  0x38   : > { %p945_p5 = pneg %p944_p3  ;;  %p949_p1 = por %p948_p9, %p947_p7 }
  0x3a   : > { %p951_p4 = por %p950_p2, %p949_p1 }
  0x3c   : > { %p952_p6 = pnand %p951_p4, %p945_p5 }
  0x3e   : > { %955 = shalt.err (!%p952_p6)
}
  0x3f   : > { %s956_s26 = scalar_lea.vmem %s1240_s28, 2048  ;;  %s1106_s25 = smov [#allocation2]  }
  0x40   : > { %p957_p8 = scmp.ne.s32.totalorder %s1240_s28, %s956_s26  ;;  %s961_s24 = sshll.u32 %s1106_s25, 4  ;;  %s962_s24 = int_to_ptr.vmem [resolvable:$false] %s961_s24 }
  0x41   : > { %s963_s6 = scalar_lea.vmem %s962_s24, 4096  ;;  %p964_p3 = scmp.lt.s32.totalorder %s1240_s28, %s962_s24 }
  0x42   : > { %p959_p11 = pnand %p957_p8, %p943_p0  ;;  %p965_p7 = scmp.lt.s32.totalorder %s963_s6, %s956_s26 }
  0x44   : > { %p960_p13 = pneg %p959_p11  ;;  %p966_p9 = por %p965_p7, %p964_p3 }
  0x46   : > { %p967_p1 = pnand %p966_p9, %p960_p13 }
  0x48   : > { %970 = shalt.err (!%p967_p1)
}
  0x49   : > { %861 = dma.hbm_to_vmem [thread:$0]  (!%p1236_p10), %s1234_s10, 2048, %s1240_s28, %s1242_s11, %s1104_s12, %s1104_s12, %s1105_s13  }
  0x4a   : > { %p1505_p0 = scmp.ne.s32.totalorder %s1500_s23, 0 }
  0x4b   : > { %s1276_s14 = sand.u32 (!%p1505_p0), 1, %s1093_s16   ;;  %p1506_p5 = scmp.ne.s32.totalorder (!%p1505_p0), %s1498_s21, 0 }
  0x4c   : > { %204 = sbr.rel (%p1505_p0) target bundleno = 426 (0x1aa), region = 28  ;;  %s694_s7 = sshll.u32 (!%p1505_p0), %s1276_s14, 7 }
  0x4d   : > { %s207_s8 = scalar_lea.sflag (!%p1505_p0), [#allocation3], %s1276_s14  ;;  %s1282_s29 = scalar_lea.vmem (!%p1505_p0), [#allocation2], %s694_s7 }
  0x53   : > { %1072 = dma.done.wait (%p1506_p5), %s207_s8, 2048  }
  0x54   : > { %1074 = vsyncadd (%p1506_p5), %s207_s8, 4294965248  ;;  %p1507_p10 = scmp.eq.s32.totalorder %s1158_s19, 0 }
  0x56   : > { %1076 = dma.done.wait (%p1507_p10), [#allocation6], 2048   ;;  %p1508_p2 = pmov %p1507_p10 }
  0x57   : > { %v265_v0 = vld [vmem:[#allocation5] sm:$0xff]  ;;  %v266_v1 = vld [vmem:[#allocation5 + $0x8] sm:$0xff]  ;;  %v267_v2 = vld [vmem:[#allocation5 + $0x10] sm:$0xff]  ;;  %s1312_s21 = scalar_lea.vmem [#allocation7], %s694_s7  ;;  %s705_s23 = sshll.u32 %s1158_s19, 11 }
  0x58   : > { %1078 = vsyncadd (%p1508_p2), [#allocation6], 4294965248  ;;  %v794_v3 = vpack.c.bf16 %v266_v1, %v265_v0  ;;  %v268_v4 = vld [vmem:[#allocation5 + $0x18] sm:$0xff]  ;;  %v269_v6 = vld [vmem:[#allocation5 + $0x20] sm:$0xff]  ;;  %s524_s12 = sshll.u32 %s1312_s21, 4  ;;  %s1347_s28 = scalar_lea.hbm %s1492_s2, %s705_s23  ;;  %s1349_s12 = int_to_ptr.vmem [resolvable:$true] %s524_s12 }
  0x59   : > { %v798_v5 = vpack.c.bf16 %v268_v4, %v267_v2  ;;  %v270_v7 = vld [vmem:[#allocation5 + $0x28] sm:$0xff]  ;;  %v249_v9 = vld [vmem:[%s1282_s29] sm:$0xff]  ;;  %v271_v10 = vld [vmem:[#allocation5 + $0x30] sm:$0xff]  ;;  %s503_s11 = scalar_lea.sflag [#allocation4], %s1276_s14  ;;  %s971_s9 = scalar_lea.vmem %s1349_s12, 2048 }
  0x5a   : > { %795 = vmatprep.subr.bf16.mxu0 %v794_v3  ;;  %826 = vmatprep.subr.bf16.mxu1 %v794_v3  ;;  %v802_v8 = vpack.c.bf16 %v270_v7, %v269_v6  ;;  %v272_v11 = vld [vmem:[#allocation5 + $0x38] sm:$0xff]  ;;  %v257_v12 = vld [vmem:[%s1282_s29 + $0x40] sm:$0xff]  ;;  %v274_v15 = vld [vmem:[#allocation5 + $0x48] sm:$0xff]  ;;  %p972_p4 = scmp.ne.s32.totalorder %s1349_s12, %s971_s9  ;;  %s1107_s26 = smov [#allocation7]  }
  0x5b   : > { %797 = vmatpush3.bf16.msra.mxu0 %v794_v3  ;;  %834 = vmatpush3.bf16.msra.mxu1 %v794_v3  ;;  %v806_v13 = vpack.c.bf16 %v272_v11, %v271_v10  ;;  %v273_v14 = vld [vmem:[#allocation5 + $0x40] sm:$0xff]  ;;  %v275_v17 = vld [vmem:[#allocation5 + $0x50] sm:$0xff]  ;;  %v276_v18 = vld [vmem:[#allocation5 + $0x58] sm:$0xff]  ;;  %s975_s25 = sshll.u32 %s1107_s26, 4  ;;  %s976_s25 = int_to_ptr.vmem [resolvable:$false] %s975_s25 }
  0x5c   : > { %799 = vmatprep.subr.bf16.mxu0 %v798_v5  ;;  %827 = vmatprep.subr.bf16.mxu1 %v798_v5  ;;  %v810_v16 = vpack.c.bf16 %v274_v15, %v273_v14  ;;  %v814_v19 = vpack.c.bf16 %v276_v18, %v275_v17  ;;  %v277_v20 = vld [vmem:[#allocation5 + $0x60] sm:$0xff]  ;;  %v278_v21 = vld [vmem:[#allocation5 + $0x68] sm:$0xff]  ;;  %v279_v23 = vld [vmem:[#allocation5 + $0x70] sm:$0xff]  ;;  %p973_p6 = pnand %p972_p4, %p1225_p12  ;;  %s977_s24 = scalar_lea.vmem %s976_s25, 4096 }
  0x5d   : > { %770 = vmatprep.mubr.f32.mxu0 %v249_v9  ;;  %782 = vmatprep.mubr.f32.mxu1 %v257_v12  ;;  %v818_v22 = vpack.c.bf16 %v278_v21, %v277_v20  ;;  %v280_v24 = vld [vmem:[#allocation5 + $0x78] sm:$0xff]  ;;  %v250_v26 = vld [vmem:[%s1282_s29 + $0x8] sm:$0xff]  ;;  %v251_v28 = vld [vmem:[%s1282_s29 + $0x10] sm:$0xff]  ;;  %p978_p11 = scmp.lt.s32.totalorder %s1349_s12, %s976_s25  ;;  %p979_p13 = scmp.lt.s32.totalorder %s977_s24, %s971_s9 }
  0x5e   : > { %v822_v25 = vpack.c.bf16 %v280_v24, %v279_v23  ;;  %v258_v27 = vld [vmem:[%s1282_s29 + $0x48] sm:$0xff]  ;;  %v259_v29 = vld [vmem:[%s1282_s29 + $0x50] sm:$0xff]  ;;  %v252_v30 = vld [vmem:[%s1282_s29 + $0x18] sm:$0xff]  ;;  %p974_p8 = pneg %p973_p6 }
  0x5f   : > { %801 = vmatpush3.bf16.msra.mxu0 %v798_v5  ;;  %835 = vmatpush3.bf16.msra.mxu1 %v798_v5  ;;  %v260_v31 = vld [vmem:[%s1282_s29 + $0x58] sm:$0xff]  ;;  %v253_v32 = vld [vmem:[%s1282_s29 + $0x20] sm:$0xff]  ;;  %v254_v34 = vld [vmem:[%s1282_s29 + $0x28] sm:$0xff]  ;;  %p980_p3 = por %p979_p13, %p978_p11 }
  0x60   : > { %803 = vmatprep.subr.bf16.mxu0 %v802_v8  ;;  %828 = vmatprep.subr.bf16.mxu1 %v802_v8  ;;  %v261_v33 = vld [vmem:[%s1282_s29 + $0x60] sm:$0xff]  ;;  %v262_v35 = vld [vmem:[%s1282_s29 + $0x68] sm:$0xff]  ;;  %v255_v36 = vld [vmem:[%s1282_s29 + $0x30] sm:$0xff] }
  0x61   : > { %v263_v37 = vld [vmem:[%s1282_s29 + $0x70] sm:$0xff]  ;;  %v256_v38 = vld [vmem:[%s1282_s29 + $0x38] sm:$0xff]  ;;  %p981_p7 = pnand %p980_p3, %p974_p8 }
  0x62   : > { %v264_v39 = vld [vmem:[%s1282_s29 + $0x78] sm:$0xff] }
  0x63   : > { %805 = vmatpush3.bf16.msra.mxu0 %v802_v8  ;;  %836 = vmatpush3.bf16.msra.mxu1 %v802_v8 }
  0x64   : > { %807 = vmatprep.subr.bf16.mxu0 %v806_v13  ;;  %829 = vmatprep.subr.bf16.mxu1 %v806_v13 }
  0x67   : > { %809 = vmatpush3.bf16.msra.mxu0 %v806_v13  ;;  %837 = vmatpush3.bf16.msra.mxu1 %v806_v13 }
  0x68   : > { %811 = vmatprep.subr.bf16.mxu0 %v810_v16  ;;  %830 = vmatprep.subr.bf16.mxu1 %v810_v16 }
  0x6b   : > { %813 = vmatpush3.bf16.msra.mxu0 %v810_v16  ;;  %838 = vmatpush3.bf16.msra.mxu1 %v810_v16 }
  0x6c   : > { %815 = vmatprep.subr.bf16.mxu0 %v814_v19  ;;  %831 = vmatprep.subr.bf16.mxu1 %v814_v19 }
  0x6f   : > { %817 = vmatpush3.bf16.msra.mxu0 %v814_v19  ;;  %839 = vmatpush3.bf16.msra.mxu1 %v814_v19 }
  0x70   : > { %819 = vmatprep.subr.bf16.mxu0 %v818_v22  ;;  %832 = vmatprep.subr.bf16.mxu1 %v818_v22 }
  0x73   : > { %821 = vmatpush3.bf16.msra.mxu0 %v818_v22  ;;  %840 = vmatpush3.bf16.msra.mxu1 %v818_v22 }
  0x74   : > { %823 = vmatprep.subr.bf16.mxu0 %v822_v25  ;;  %833 = vmatprep.subr.bf16.mxu1 %v822_v25 }
  0x77   : > { %825 = vmatpush3.bf16.msra.mxu0 %v822_v25  ;;  %841 = vmatpush3.bf16.msra.mxu1 %v822_v25 }
  0x7a   : > { %771 = vmatmul.mubr.f32.vlgmr.msra.gmra.mrb[0].mxu0 %v250_v26  ;;  %783 = vmatmul.mubr.f32.vlgmr.msra.gmra.mrb[0].mxu1 %v258_v27 }
  0x7b   : > { %773 = vmatprep.mubr.f32.mxu0 %v251_v28  ;;  %785 = vmatprep.mubr.f32.mxu1 %v259_v29 }
  0x7e   : > { %774 = vmatmul.mubr.f32.gmra.mrb[2].mxu0 %v252_v30  ;;  %786 = vmatmul.mubr.f32.gmra.mrb[2].mxu1 %v260_v31 }
  0x7f   : > { %776 = vmatprep.mubr.f32.mxu0 %v253_v32  ;;  %788 = vmatprep.mubr.f32.mxu1 %v261_v33 }
  0x82   : > { %777 = vmatmul.mubr.f32.gmra.mrb[4].mxu0 %v254_v34  ;;  %789 = vmatmul.mubr.f32.gmra.mrb[4].mxu1 %v262_v35 }
  0x83   : > { %779 = vmatprep.mubr.f32.mxu0 %v255_v36  ;;  %791 = vmatprep.mubr.f32.mxu1 %v263_v37 }
  0x86   : > { %780 = vmatmul.mubr.f32.gmra.mrb[6].mxu0 %v256_v38  ;;  %792 = vmatmul.mubr.f32.gmra.mrb[6].mxu1 %v264_v39 }
 0x14d   : > { %v772_v40 = vpop.f32.mrb[0].mxu0  ;;  %v1308_v41 = vpop.f32.mrb[0].mxu1 }
 0x14e   : > { %427 = vst [vmem:[%s1312_s21 + $0x8] sm:$0xff] %v772_v40  ;;  %v465_v42 = vmul.f32 %v772_v40, %v772_v40  ;;  %v347_v43 = vpop.f32.mrb[1].mxu0  ;;  %435 = vst [vmem:[%s1312_s21 + $0x48] sm:$0xff] %v1308_v41  ;;  %v1317_v44 = vpop.f32.mrb[1].mxu1 }
 0x14f   : > { %426 = vst [vmem:[%s1312_s21] sm:$0xff] %v347_v43  ;;  %v442_v45 = vadd.f32 %v772_v40, %v347_v43  ;;  %v464_v46 = vmul.f32 %v347_v43, %v347_v43  ;;  %434 = vst [vmem:[%s1312_s21 + $0x40] sm:$0xff] %v1317_v44 }
 0x151   : > { %v480_v47 = vadd.f32 %v465_v42, %v464_v46  ;;  %v775_v48 = vpop.f32.mrb[2].mxu0  ;;  %v1322_v49 = vpop.f32.mrb[2].mxu1 }
 0x152   : > { %429 = vst [vmem:[%s1312_s21 + $0x18] sm:$0xff] %v775_v48  ;;  %v357_v50 = vpop.f32.mrb[3].mxu0  ;;  %437 = vst [vmem:[%s1312_s21 + $0x58] sm:$0xff] %v1322_v49  ;;  %v1327_v51 = vpop.f32.mrb[3].mxu1  ;;  %v467_v54 = vmul.f32 %v775_v48, %v775_v48 }
 0x153   : > { %428 = vst [vmem:[%s1312_s21 + $0x10] sm:$0xff] %v357_v50  ;;  %v443_v52 = vadd.f32 %v442_v45, %v357_v50  ;;  %v466_v53 = vmul.f32 %v357_v50, %v357_v50  ;;  %436 = vst [vmem:[%s1312_s21 + $0x50] sm:$0xff] %v1327_v51 }
 0x155   : > { %v481_v55 = vadd.f32 %v480_v47, %v466_v53  ;;  %v778_v56 = vpop.f32.mrb[4].mxu0  ;;  %v444_v57 = vadd.f32 %v775_v48, %v443_v52  ;;  %v1332_v58 = vpop.f32.mrb[4].mxu1 }
 0x156   : > { %431 = vst [vmem:[%s1312_s21 + $0x28] sm:$0xff] %v778_v56  ;;  %v367_v59 = vpop.f32.mrb[5].mxu0  ;;  %439 = vst [vmem:[%s1312_s21 + $0x68] sm:$0xff] %v1332_v58  ;;  %v1339_v60 = vpop.f32.mrb[5].mxu1  ;;  %v469_v0 = vmul.f32 %v778_v56, %v778_v56 }
 0x157   : > { %430 = vst [vmem:[%s1312_s21 + $0x20] sm:$0xff] %v367_v59  ;;  %v445_v61 = vadd.f32 %v444_v57, %v367_v59  ;;  %v468_v62 = vmul.f32 %v367_v59, %v367_v59  ;;  %v482_v63 = vadd.f32 %v481_v55, %v467_v54  ;;  %438 = vst [vmem:[%s1312_s21 + $0x60] sm:$0xff] %v1339_v60 }
 0x159   : > { %v483_v1 = vadd.f32 %v482_v63, %v468_v62  ;;  %v781_v2 = vpop.f32.mrb[6].mxu0  ;;  %v446_v3 = vadd.f32 %v778_v56, %v445_v61  ;;  %v1351_v4 = vpop.f32.mrb[6].mxu1 }
 0x15a   : > { %433 = vst [vmem:[%s1312_s21 + $0x38] sm:$0xff] %v781_v2  ;;  %v377_v5 = vpop.f32.mrb[7].mxu0  ;;  %441 = vst [vmem:[%s1312_s21 + $0x78] sm:$0xff] %v1351_v4  ;;  %v417_v6 = vpop.f32.mrb[7].mxu1 }
 0x15b   : > { %432 = vst [vmem:[%s1312_s21 + $0x30] sm:$0xff] %v377_v5  ;;  %v447_v7 = vadd.f32 %v446_v3, %v377_v5  ;;  %v470_v8 = vmul.f32 %v377_v5, %v377_v5  ;;  %v484_v9 = vadd.f32 %v483_v1, %v469_v0  ;;  %440 = vst [vmem:[%s1312_s21 + $0x70] sm:$0xff] %v417_v6 }
 0x15c   : > { %984 = shalt.err (!%p981_p7)
}
 0x15d   : > { %s985_s6 = scalar_lea.hbm %s1347_s28, 2048  ;;  %s989_s29 = scalar_lea.hbm %s1492_s2, 8192 }
 0x15e   : > { %p986_p9 = scmp.ne.s32.totalorder %s1347_s28, %s985_s6  ;;  %p990_p5 = scmp.lt.u32.totalorder %s1347_s28, %s1492_s2 }
 0x15f   : > { %p991_p10 = scmp.lt.u32.totalorder %s989_s29, %s985_s6  ;;  %p993_p4 = scmp.lt.u32.totalorder %s985_s6, %s1347_s28 }
 0x160   : > { %p987_p1 = pnand %p986_p9, %p1225_p12 }
 0x161   : > { %p992_p2 = por %p991_p10, %p990_p5 }
 0x162   : > { %p988_p0 = pneg %p987_p1 }
 0x163   : > { %p994_p6 = por %p993_p4, %p992_p2 }
 0x165   : > { %p995_p8 = pnand %p994_p6, %p988_p0 }
 0x167   : > { %998 = shalt.err (!%p995_p8)
}
 0x168   : > { %s1108_s13 = smov 128   ;;  %s1109_s10 = smov 8   ;;  %v471_v10 = vmul.f32 %v781_v2, %v781_v2  ;;  %v448_v11 = vadd.f32 %v781_v2, %v447_v7  ;;  %v485_v12 = vadd.f32 %v484_v9, %v470_v8  ;;  %v472_v13 = vmul.f32 %v1317_v44, %v1317_v44 }
 0x169   : > { %848 = dma.vmem_to_hbm [thread:$0]  (%p1225_p12), %s1349_s12, 2048, %s1347_s28, %s503_s11, %s1108_s13, %s1108_s13, %s1109_s10   ;;  %v473_v16 = vmul.f32 %v1308_v41, %v1308_v41  ;;  %v474_v19 = vmul.f32 %v1327_v51, %v1327_v51  ;;  %v475_v22 = vmul.f32 %v1322_v49, %v1322_v49  ;;  %v476_v25 = vmul.f32 %v1339_v60, %v1339_v60 }
 0x16a   : > { %v486_v14 = vadd.f32 %v485_v12, %v471_v10  ;;  %v449_v15 = vadd.f32 %v448_v11, %v1317_v44  ;;  %v477_v28 = vmul.f32 %v1332_v58, %v1332_v58  ;;  %v478_v31 = vmul.f32 %v417_v6, %v417_v6  ;;  %s507_s12 = sand.u32 1, %s1158_s19   ;;  %s700_s28 = sshll.u32 %s1158_s19, 4 }
 0x16b   : > { %v479_v34 = vmul.f32 %v1351_v4, %v1351_v4  ;;  %s240_s11 = scalar_lea.vmem [#allocation8], %s1276_s14  ;;  %s246_s26 = scalar_lea.vmem [#allocation10], %s1276_s14 }
 0x16c   : > { %v487_v17 = vadd.f32 %v486_v14, %v472_v13  ;;  %v450_v18 = vadd.f32 %v1308_v41, %v449_v15  ;;  %s540_s9 = sshll.u32 %s240_s11, 4  ;;  %s553_s25 = sshll.u32 %s246_s26, 4  ;;  %s1414_s9 = int_to_ptr.vmem [resolvable:$true] %s540_s9  ;;  %s1421_s25 = int_to_ptr.vmem [resolvable:$true] %s553_s25 }
 0x16d   : > { %s1412_s7 = scalar_lea.hbm %s1493_s3, %s700_s28  ;;  %s1419_s29 = scalar_lea.hbm %s1494_s4, %s700_s28 }
 0x16e   : > { %v451_v20 = vadd.f32 %v450_v18, %v1327_v51  ;;  %v488_v21 = vadd.f32 %v487_v17, %v473_v16  ;;  %s1423_s21 = scalar_lea.sflag [#allocation9], %s507_s12  ;;  %s999_s23 = scalar_lea.vmem %s1414_s9, 16 }
 0x16f   : > { %p1000_p11 = scmp.ne.s32.totalorder %s1414_s9, %s999_s23  ;;  %s1110_s13 = smov [#allocation8]  }
 0x170   : > { %v489_v23 = vadd.f32 %v488_v21, %v474_v19  ;;  %v452_v24 = vadd.f32 %v1322_v49, %v451_v20  ;;  %s1003_s10 = sshll.u32 %s1110_s13, 4  ;;  %s1004_s10 = int_to_ptr.vmem [resolvable:$false] %s1003_s10 }
 0x171   : > { %p1001_p13 = pnand %p1000_p11, %p1225_p12  ;;  %s1005_s24 = scalar_lea.vmem %s1004_s10, 32 }
 0x172   : > { %v453_v26 = vadd.f32 %v452_v24, %v1339_v60  ;;  %v490_v27 = vadd.f32 %v489_v23, %v475_v22  ;;  %p1006_p7 = scmp.lt.s32.totalorder %s1414_s9, %s1004_s10  ;;  %p1007_p9 = scmp.lt.s32.totalorder %s1005_s24, %s999_s23 }
 0x173   : > { %p1002_p3 = pneg %p1001_p13 }
 0x174   : > { %v491_v29 = vadd.f32 %v490_v27, %v476_v25  ;;  %v454_v30 = vadd.f32 %v1332_v58, %v453_v26  ;;  %p1008_p1 = por %p1007_p9, %p1006_p7 }
 0x176   : > { %v455_v32 = vadd.f32 %v454_v30, %v417_v6  ;;  %v492_v33 = vadd.f32 %v491_v29, %v477_v28  ;;  %p1009_p0 = pnand %p1008_p1, %p1002_p3 }
 0x178   : > { %v456_v35 = vadd.f32 %v1351_v4, %v455_v32  ;;  %v493_v36 = vadd.f32 %v492_v33, %v478_v31 }
 0x17a   : > { %v457_v37 = vrot.slane %v456_v35, 4  ;;  %v494_v38 = vadd.f32 %v493_v36, %v479_v34 }
 0x17c   : > { %v458_v39 = vadd.f32 %v457_v37, %v456_v35  ;;  %v495_v40 = vrot.slane %v494_v38, 4 }
 0x17e   : > { %v459_v41 = vrot.slane %v458_v39, 2  ;;  %v496_v42 = vadd.f32 %v495_v40, %v494_v38 }
 0x180   : > { %v460_v43 = vadd.f32 %v459_v41, %v458_v39  ;;  %v497_v44 = vrot.slane %v496_v42, 2 }
 0x182   : > { %v461_v45 = vrot.slane %v460_v43, 1  ;;  %v498_v46 = vadd.f32 %v497_v44, %v496_v42 }
 0x184   : > { %v462_v47 = vadd.f32 %v461_v45, %v460_v43  ;;  %v499_v48 = vrot.slane %v498_v46, 1 }
 0x186   : > { %v500_v49 = vadd.f32 %v499_v48, %v498_v46  ;;  %463 = vst [vmem:[%s240_s11] sm:$0x1] %v462_v47 }
 0x187   : > { %1012 = shalt.err (!%p1009_p0)
}
 0x188   : > { %s1013_s12 = scalar_lea.hbm %s1412_s7, 16  ;;  %s1017_s6 = scalar_lea.hbm %s1493_s3, 64 }
 0x189   : > { %p1014_p5 = scmp.ne.s32.totalorder %s1412_s7, %s1013_s12  ;;  %p1018_p4 = scmp.lt.u32.totalorder %s1412_s7, %s1493_s3 }
 0x18a   : > { %p1019_p6 = scmp.lt.u32.totalorder %s1017_s6, %s1013_s12  ;;  %p1021_p11 = scmp.lt.u32.totalorder %s1013_s12, %s1412_s7 }
 0x18b   : > { %p1015_p10 = pnand %p1014_p5, %p1225_p12 }
 0x18c   : > { %p1020_p8 = por %p1019_p6, %p1018_p4 }
 0x18d   : > { %p1016_p2 = pneg %p1015_p10 }
 0x18e   : > { %p1022_p13 = por %p1021_p11, %p1020_p8 }
 0x190   : > { %p1023_p3 = pnand %p1022_p13, %p1016_p2 }
 0x192   : > { %1026 = shalt.err (!%p1023_p3)
}
 0x193   : > { %849 = dma.vmem_to_hbm [thread:$0]  (%p1225_p12), %s1414_s9, 16, %s1412_s7, %s1423_s21   ;;  %501 = vst [vmem:[%s246_s26] sm:$0x1] %v500_v49 }
 0x194   : > { %s1027_s23 = scalar_lea.vmem %s1421_s25, 16  ;;  %s1111_s13 = smov [#allocation10]  }
 0x195   : > { %p1028_p7 = scmp.ne.s32.totalorder %s1421_s25, %s1027_s23  ;;  %s1031_s10 = sshll.u32 %s1111_s13, 4  ;;  %s1032_s10 = int_to_ptr.vmem [resolvable:$false] %s1031_s10 }
 0x196   : > { %s1033_s24 = scalar_lea.vmem %s1032_s10, 32  ;;  %p1034_p0 = scmp.lt.s32.totalorder %s1421_s25, %s1032_s10 }
 0x197   : > { %p1029_p9 = pnand %p1028_p7, %p1225_p12  ;;  %p1035_p5 = scmp.lt.s32.totalorder %s1033_s24, %s1027_s23 }
 0x199   : > { %p1030_p1 = pneg %p1029_p9  ;;  %p1036_p10 = por %p1035_p5, %p1034_p0 }
 0x19b   : > { %p1037_p2 = pnand %p1036_p10, %p1030_p1 }
 0x19d   : > { %1040 = shalt.err (!%p1037_p2)
}
 0x19e   : > { %s1041_s14 = scalar_lea.hbm %s1419_s29, 16  ;;  %s1045_s7 = scalar_lea.hbm %s1494_s4, 64 }
 0x19f   : > { %p1042_p4 = scmp.ne.s32.totalorder %s1419_s29, %s1041_s14  ;;  %p1046_p11 = scmp.lt.u32.totalorder %s1419_s29, %s1494_s4 }
 0x1a0   : > { %p1047_p13 = scmp.lt.u32.totalorder %s1045_s7, %s1041_s14  ;;  %p1049_p7 = scmp.lt.u32.totalorder %s1041_s14, %s1419_s29 }
 0x1a1   : > { %p1043_p6 = pnand %p1042_p4, %p1225_p12 }
 0x1a2   : > { %p1048_p3 = por %p1047_p13, %p1046_p11 }
 0x1a3   : > { %p1044_p8 = pneg %p1043_p6 }
 0x1a4   : > { %p1050_p9 = por %p1049_p7, %p1048_p3 }
 0x1a6   : > { %p1051_p1 = pnand %p1050_p9, %p1044_p8 }
 0x1a8   : > { %1054 = shalt.err (!%p1051_p1)
}
 0x1a9   : > { %850 = dma.vmem_to_hbm [thread:$0]  (%p1225_p12), %s1421_s25, 16, %s1419_s29, %s1423_s21  }
 0x1aa PF: > { %p875_p0 = scmp.ge.s32.totalorder %s1101_s18, 2  ;;  %s565_s11 = sand.u32 1, %s1089_s15  }
 0x1ab   : > { %p1509_p5 = scmp.ne.s32.totalorder %s1499_s22, 0  ;;  %s566_s6 = scalar_lea.sflag [#allocation4], %s565_s11 }
 0x1ad   : > { %p863_p10 = pnand %p875_p0, %p1509_p5 }
 0x1af   : > { %1080 = dma.done.wait (!%p863_p10), %s566_s6, 2048  }
 0x1b0   : > { %1082 = vsyncadd (!%p863_p10), %s566_s6, 4294965248  ;;  %s574_s19 = sand.u32 1, %s686_s20  }
 0x1b1   : > { %s575_s8 = scalar_lea.sflag [#allocation9], %s574_s19 }
 0x1b2   : > { %1084 = dma.done.wait (!%p863_p10), %s575_s8, 32  }
 0x1b3   : > { %1086 = vsyncadd (!%p863_p10), %s575_s8, 4294967264  ;;  %p22_p12 = scmp.ge.s32.totalorder %s1192_s27, 6   ;;  %s1510_s15 = smov %s1093_s16 }
 0x1b4   : > { %s1511_s16 = smov %s1097_s17  ;;  %s1512_s17 = smov %s1221_s30 }
 0x1b5   : > { %s1513_s18 = smov %s1192_s27  ;;  %24 = sbr.rel (!%p22_p12) target bundleno = 8 (0x8), region = 109 }
 0x1bc   :  { %587 = vsyncpa [#allocation3], 1 }
 0x1bd   :  { %589 = vsyncpa [#allocation3 + $0x1], 1 }
 0x1be   :  { %590 = vsyncpa [#allocation6], 1 }
 0x1bf   :  { %591 = vsyncpa [#allocation4], 1 }
 0x1c0   :  { %593 = vsyncpa [#allocation4 + $0x1], 1 }
 0x1c1   :  { %594 = vsyncpa [#allocation9], 1 }
 0x1c2   :  { %596 = vsyncpa [#allocation9 + $0x1], 1 }

</bundles_post_ra>
